<compile_context>
chip_gen: v7x
topology: tpu7x:2x2x1
jax: 0.10.0
libtpu: 0.0.40
codegen_flags: <defaults>
</compile_context>

<pallas_src>
import functools

import jax
import jax.numpy as jnp
from jax.experimental import pallas as pl
from jax.experimental.pallas import tpu as pltpu


def _round_up(x, m):
    return (x + m - 1) // m * m


def critic_kernel(x_ref, w_ref, out_ref, *, num_inputs, ni_pad, h2):
    """x_ref: (B, NI). w_ref: packed (rows, 2H) slab. out_ref: (B, 1)."""
    off_wb = ni_pad                # block-diagonal layer-2 weight
    off_wc = ni_pad + h2           # padded layer-3 weight (heads in lanes 0/1)
    off_b = ni_pad + 2 * h2        # 3 bias rows

    x = x_ref[...]                                            # (B, NI)

    # Layer 1 (both heads fused): (B, NI) @ [W1 | W4] + [b1|b4], relu.
    wa = w_ref[0:num_inputs, :]                               # (NI, 2H)
    h = jnp.dot(x, wa, preferred_element_type=jnp.float32)
    h = jnp.maximum(h + w_ref[off_b:off_b + 1, :], 0.0)

    # Layer 2 (block-diagonal [W2 0; 0 W5]): (B, 2H) @ (2H, 2H) + [b2|b5], relu.
    wb = w_ref[off_wb:off_wb + h2, :]                         # (2H, 2H)
    h = jnp.dot(h, wb, preferred_element_type=jnp.float32)
    h = jnp.maximum(h + w_ref[off_b + 1:off_b + 2, :], 0.0)

    # Layer 3: heads stacked in lanes 0/1 of a full 64-lane operand, zero
    # elsewhere (unmasked load, single MXU pass); full 64-lane bias row.
    wc = w_ref[off_wc:off_wc + h2, :]                         # (2H, 2H)
    q = jnp.dot(h, wc, preferred_element_type=jnp.float32)
    q = q + w_ref[off_b + 2:off_b + 3, :]

    # Twin-Q min fused into the kernel: lane 0 = q1, lane 1 = q2.
    out_ref[...] = jnp.minimum(q[:, 0:1], q[:, 1:2]).astype(out_ref.dtype)


def critic_forward(state, slab):
    """state: (batch, num_inputs) f32.  slab: packed params (rows, 2H) f32."""
    batch, num_inputs = state.shape
    h2 = slab.shape[1]
    ni_pad = _round_up(num_inputs, 8)

    kernel = functools.partial(
        critic_kernel, num_inputs=num_inputs, ni_pad=ni_pad, h2=h2)

    # Single grid point; both operands are small enough to live fully in VMEM.
    return pl.pallas_call(
        kernel,
        out_shape=jax.ShapeDtypeStruct((batch, 1), jnp.float32),
        grid=(),
        in_specs=[
            pl.BlockSpec(state.shape, lambda: (0, 0), memory_space=pltpu.VMEM),
            pl.BlockSpec(slab.shape, lambda: (0, 0), memory_space=pltpu.VMEM),
        ],
        out_specs=pl.BlockSpec((batch, 1), lambda: (0, 0),
                               memory_space=pltpu.VMEM),
    )(state, slab)


def xavier_uniform(key, shape_out_in):
    """PyTorch xavier_uniform_ on a Linear weight of shape (out, in), gain=1."""
    fan_out, fan_in = shape_out_in
    limit = (6.0 / (fan_in + fan_out)) ** 0.5
    w = jax.random.uniform(key, shape_out_in, jnp.float32, -limit, limit)
    return w.T  # (in, out) for x @ W layout


def init_critic_params(key, num_inputs, hidden_dim):
    keys = jax.random.split(key, 6)
    p = {}
    p["w1"] = xavier_uniform(keys[0], (hidden_dim, num_inputs))
    p["b1"] = jnp.zeros((1, hidden_dim), jnp.float32)
    p["w2"] = xavier_uniform(keys[1], (hidden_dim, hidden_dim))
    p["b2"] = jnp.zeros((1, hidden_dim), jnp.float32)
    p["w3"] = xavier_uniform(keys[2], (1, hidden_dim))
    p["b3"] = jnp.zeros((1, 1), jnp.float32)
    p["w4"] = xavier_uniform(keys[3], (hidden_dim, num_inputs))
    p["b4"] = jnp.zeros((1, hidden_dim), jnp.float32)
    p["w5"] = xavier_uniform(keys[4], (hidden_dim, hidden_dim))
    p["b5"] = jnp.zeros((1, hidden_dim), jnp.float32)
    p["w6"] = xavier_uniform(keys[5], (1, hidden_dim))
    p["b6"] = jnp.zeros((1, 1), jnp.float32)
    return p


def pack_critic_params(p, num_inputs, hidden_dim):
    """Pack all 6 weights + 6 biases into one (rows, 2H) f32 slab.

    Row layout (8-aligned offsets):
      [0            : num_inputs ]  [W1 | W4]                 layer 1
      [ni_pad       : ni_pad+2H  ]  [[W2, 0], [0, W5]]        layer 2 (blockdiag)
      [ni_pad+2H    : ni_pad+4H  ]  [w3 in lane 0, w6 lane 1] layer 3 (64 lanes)
      [ni_pad+4H    : ni_pad+4H+3]  bias rows [b1|b4], [b2|b5], [b3,b6,0,...]
    Must be called once per parameter update, outside the per-step path.
    """
    H = hidden_dim
    h2 = 2 * H
    ni_pad = _round_up(num_inputs, 8)
    off_wb = ni_pad
    off_wc = ni_pad + h2
    off_b = ni_pad + 2 * h2
    total_rows = _round_up(off_b + 3, 8)

    slab = jnp.zeros((total_rows, h2), jnp.float32)
    # Layer 1: [W1 | W4]
    slab = slab.at[0:num_inputs, 0:H].set(p["w1"])
    slab = slab.at[0:num_inputs, H:h2].set(p["w4"])
    # Layer 2: block-diagonal
    slab = slab.at[off_wb:off_wb + H, 0:H].set(p["w2"])
    slab = slab.at[off_wb + H:off_wb + h2, H:h2].set(p["w5"])
    # Layer 3: head 1 in lane 0, head 2 in lane 1, zeros elsewhere
    slab = slab.at[off_wc:off_wc + H, 0:1].set(p["w3"])
    slab = slab.at[off_wc + H:off_wc + h2, 1:2].set(p["w6"])
    # Biases
    slab = slab.at[off_b, 0:H].set(p["b1"][0])
    slab = slab.at[off_b, H:h2].set(p["b4"][0])
    slab = slab.at[off_b + 1, 0:H].set(p["b2"][0])
    slab = slab.at[off_b + 1, H:h2].set(p["b5"][0])
    slab = slab.at[off_b + 2, 0].set(p["b3"][0, 0])
    slab = slab.at[off_b + 2, 1].set(p["b6"][0, 0])
    return slab


def critic_ref(state, p):
    """Pure-JAX reference (unpacked params) for correctness check."""
    x1 = jax.nn.relu(state @ p["w1"] + p["b1"])
    x1 = jax.nn.relu(x1 @ p["w2"] + p["b2"])
    x1 = x1 @ p["w3"] + p["b3"]
    x2 = jax.nn.relu(state @ p["w4"] + p["b4"])
    x2 = jax.nn.relu(x2 @ p["w5"] + p["b5"])
    x2 = x2 @ p["w6"] + p["b6"]
    return jnp.minimum(x1, x2)


if __name__ == "__main__":
    num_inputs, hidden_dim, batch = 16, 32, 8

    key = jax.random.PRNGKey(0)
    k_params, k_state = jax.random.split(key)
    params = init_critic_params(k_params, num_inputs, hidden_dim)
    slab = pack_critic_params(params, num_inputs, hidden_dim)  # once per update
    state = jax.random.normal(k_state, (batch, num_inputs), jnp.float32)

    out = critic_forward(state, slab)
    out = jax.block_until_ready(out)

    ref = critic_ref(state, params)
    assert out.shape == (batch, 1), out.shape
    assert jnp.allclose(out, ref, atol=1e-5, rtol=1e-5), "mismatch vs reference"

    print("KERNEL_OK")
</pallas_src>

<mosaic_0001>
module attributes {stable_mosaic.version = 11 : i64} {
  func.func @critic_kernel(%arg0: memref<8x16xf32, #tpu.memory_space<vmem>>, %arg1: memref<152x64xf32, #tpu.memory_space<vmem>>, %arg2: memref<8x1xf32, #tpu.memory_space<vmem>>) attributes {dimension_semantics = [], scalar_prefetch = 0 : i64, scratch_operands = 0 : i64, tpu.core_type = #tpu.core_type<tc>} {
    %c0 = arith.constant 0 : index
    %c0_0 = arith.constant 0 : index
    %0 = vector.load %arg0[%c0, %c0_0] : memref<8x16xf32, #tpu.memory_space<vmem>>, vector<8x16xf32>
    %c0_1 = arith.constant 0 : index
    %c0_2 = arith.constant 0 : index
    %1 = vector.load %arg1[%c0_1, %c0_2] : memref<152x64xf32, #tpu.memory_space<vmem>>, vector<16x64xf32>
    %cst = arith.constant dense<0.000000e+00> : vector<8x64xf32>
    %2 = tpu.matmul %0, %1, %cst {dimension_numbers = #tpu.dot_dimension_numbers<[1], [0], [0], [1], [0, 0, 1, 1], [], []>} : vector<8x16xf32>, vector<16x64xf32>, vector<8x64xf32> -> vector<8x64xf32>
    %c144 = arith.constant 144 : index
    %c0_3 = arith.constant 0 : index
    %3 = vector.load %arg1[%c144, %c0_3] : memref<152x64xf32, #tpu.memory_space<vmem>>, vector<1x64xf32>
    %4 = vector.broadcast %3 : vector<1x64xf32> to vector<8x64xf32>
    %5 = arith.addf %2, %4 : vector<8x64xf32>
    %cst_4 = arith.constant 0.000000e+00 : f32
    %6 = vector.broadcast %cst_4 : f32 to vector<8x64xf32>
    %7 = arith.maximumf %5, %6 : vector<8x64xf32>
    %c16 = arith.constant 16 : index
    %c0_5 = arith.constant 0 : index
    %8 = vector.load %arg1[%c16, %c0_5] : memref<152x64xf32, #tpu.memory_space<vmem>>, vector<64x64xf32>
    %cst_6 = arith.constant dense<0.000000e+00> : vector<8x64xf32>
    %9 = tpu.matmul %7, %8, %cst_6 {dimension_numbers = #tpu.dot_dimension_numbers<[1], [0], [0], [1], [0, 0, 1, 1], [], []>} : vector<8x64xf32>, vector<64x64xf32>, vector<8x64xf32> -> vector<8x64xf32>
    %c145 = arith.constant 145 : index
    %c0_7 = arith.constant 0 : index
    %10 = vector.load %arg1[%c145, %c0_7] : memref<152x64xf32, #tpu.memory_space<vmem>>, vector<1x64xf32>
    %11 = vector.broadcast %10 : vector<1x64xf32> to vector<8x64xf32>
    %12 = arith.addf %9, %11 : vector<8x64xf32>
    %cst_8 = arith.constant 0.000000e+00 : f32
    %13 = vector.broadcast %cst_8 : f32 to vector<8x64xf32>
    %14 = arith.maximumf %12, %13 : vector<8x64xf32>
    %c80 = arith.constant 80 : index
    %c0_9 = arith.constant 0 : index
    %15 = vector.load %arg1[%c80, %c0_9] : memref<152x64xf32, #tpu.memory_space<vmem>>, vector<64x64xf32>
    %cst_10 = arith.constant dense<0.000000e+00> : vector<8x64xf32>
    %16 = tpu.matmul %14, %15, %cst_10 {dimension_numbers = #tpu.dot_dimension_numbers<[1], [0], [0], [1], [0, 0, 1, 1], [], []>} : vector<8x64xf32>, vector<64x64xf32>, vector<8x64xf32> -> vector<8x64xf32>
    %c146 = arith.constant 146 : index
    %c0_11 = arith.constant 0 : index
    %17 = vector.load %arg1[%c146, %c0_11] : memref<152x64xf32, #tpu.memory_space<vmem>>, vector<1x64xf32>
    %18 = vector.broadcast %17 : vector<1x64xf32> to vector<8x64xf32>
    %19 = arith.addf %16, %18 : vector<8x64xf32>
    %20 = vector.extract_strided_slice %19 {offsets = [0, 0], sizes = [8, 1], strides = [1, 1]} : vector<8x64xf32> to vector<8x1xf32>
    %21 = vector.extract_strided_slice %19 {offsets = [0, 1], sizes = [8, 1], strides = [1, 1]} : vector<8x64xf32> to vector<8x1xf32>
    %22 = arith.minimumf %20, %21 : vector<8x1xf32>
    %c0_12 = arith.constant 0 : index
    %c0_13 = arith.constant 0 : index
    %23 = vector.load %arg2[%c0_12, %c0_13] : memref<8x1xf32, #tpu.memory_space<vmem>>, vector<8x1xf32>
    tpu.vector_store %arg2[%c0_12, %c0_13], %22 {strides = array<i32>} : memref<8x1xf32, #tpu.memory_space<vmem>>, vector<8x1xf32>,
    return
  }
}

</mosaic_0001>

<bundles_post_ra>
// kernel: tpu_custom_call.1
= control target key start
LH: loop header
LB: loop body
LE: loop exit
PB: predicated region body
PF: predicated region fallthrough
CT: control target
= control target key end

     0   :  { %v382_v0 = vmov 0.0|0.0   ;;  %vm383_vm0 = vmmov 0   ;;  %v384_v3 = vmov 0.0   ;;  %vm19_vm1 = vcmask 130048   ;;  %s385_s24 = smov 127   ;;  %s473_s1 = inlined_call_operand.vmem [shape: f32[152,64], index: 1, kind: input, shape index: {}]   ;;  %s474_s0 = inlined_call_operand.vmem [shape: f32[8,16], index: 0, kind: input, shape index: {}]   ;;  %s475_s2 = inlined_call_operand.vmem [shape: f32[8,1], index: 2, kind: output, shape index: {}]  }
   0x1   :  { %351 = vmatprep.subr.bf16.mxu0 %v382_v0  ;;  %v12_v1 = vld [vmem:[%s473_s1] sm:$0xff]  ;;  %v13_v2 = vld [vmem:[%s473_s1 + $0x8] sm:$0xff]  ;;  %310 = vmatprep.mubr.msk.f32.mxu0 %vm383_vm0, %v384_v3  ;;  %v94_v5 = vld [vmem:[%s473_s1 + $0x10] sm:$0xff]  ;;  %vm107_vm2 = vcmask 523264   ;;  %vm273_vm3 = vcmask 7168  }
   0x2   :  { %v352_v4 = vpack.c.bf16 %v13_v2, %v12_v1  ;;  %354 = vmatprep.subr.bf16.mxu1 %v382_v0  ;;  %v95_v6 = vld [vmem:[%s473_s1 + $0x18] sm:$0xff]  ;;  %v96_v7 = vld [vmem:[%s473_s1 + $0x20] sm:$0xff]  ;;  %329 = vmatprep.mubr.msk.f32.mxu1 %vm383_vm0, %v384_v3  ;;  %v97_v9 = vld [vmem:[%s473_s1 + $0x28] sm:$0xff] }
   0x3   :  { %v355_v8 = vpack.c.bf16 %v95_v6, %v94_v5  ;;  %v11_v10 = vld [vmem:[%s474_s0] sm:$0xff]  ;;  %v358_v11 = vpack.c.bf16 %v97_v9, %v96_v7  ;;  %v98_v12 = vld [vmem:[%s473_s1 + $0x30] sm:$0xff]  ;;  %v99_v13 = vld [vmem:[%s473_s1 + $0x38] sm:$0xff] }
   0x4   :  { %353 = vmatpush3.bf16.msra.mxu0 %v352_v4  ;;  %v361_v14 = vpack.c.bf16 %v99_v13, %v98_v12  ;;  %v100_v15 = vld [vmem:[%s473_s1 + $0x40] sm:$0xff]  ;;  %v101_v16 = vld [vmem:[%s473_s1 + $0x48] sm:$0xff]  ;;  %v182_v18 = vld [vmem:[%s473_s1 + $0x50] sm:$0xff] }
   0x5   :  { %356 = vmatpush3.bf16.msra.mxu1 %v355_v8  ;;  %366 = vmatprep.subr.bf16.mxu0 %v382_v0  ;;  %v364_v17 = vpack.c.bf16 %v101_v16, %v100_v15  ;;  %v183_v19 = vld [vmem:[%s473_s1 + $0x58] sm:$0xff]  ;;  %v184_v20 = vld [vmem:[%s473_s1 + $0x60] sm:$0xff]  ;;  %v185_v22 = vld [vmem:[%s473_s1 + $0x68] sm:$0xff] }
   0x6   :  { %357 = vmatprep.subr.bf16.mxu1 %v382_v0  ;;  %v367_v21 = vpack.c.bf16 %v183_v19, %v182_v18  ;;  %v370_v23 = vpack.c.bf16 %v185_v22, %v184_v20  ;;  %v186_v24 = vld [vmem:[%s473_s1 + $0x70] sm:$0xff]  ;;  %v187_v25 = vld [vmem:[%s473_s1 + $0x78] sm:$0xff]  ;;  %v188_v32 = vld [vmem:[%s473_s1 + $0x80] sm:$0xff] }
   0x7   :  { %311 = vmatmul.mubr.msk.f32.vlgmr.msra.gmra.mrb[0].mxu0 %vm19_vm1, %v11_v10  ;;  %v373_v26 = vpack.c.bf16 %v187_v25, %v186_v24  ;;  %v279_v27 = vld [vmem:[%s473_s1 + $0x90] ss:$0 sm:$0xff]  ;;  %v189_v33 = vld [vmem:[%s473_s1 + $0x88] sm:$0xff]  ;;  %v281_v35 = vld [vmem:[%s473_s1 + $0x91] ss:$0 sm:$0xff] }
   0x8   :  { %348 = vmatprep.mubr.msk.f32.mxu0 %vm383_vm0, %v384_v3  ;;  %368 = vmatpush3.bf16.msra.mxu0 %v367_v21  ;;  %v376_v34 = vpack.c.bf16 %v189_v33, %v188_v32  ;;  %v283_v40 = vld [vmem:[%s473_s1 + $0x92] ss:$0 sm:$0xff] }
   0x9   :  { %359 = vmatpush3.bf16.msra.mxu1 %v358_v11  ;;  %369 = vmatprep.subr.bf16.mxu0 %v382_v0 }
   0xa   :  { %360 = vmatprep.subr.bf16.mxu1 %v382_v0 }
   0xc   :  { %371 = vmatpush3.bf16.msra.mxu0 %v370_v23 }
   0xd   :  { %362 = vmatpush3.bf16.msra.mxu1 %v361_v14  ;;  %372 = vmatprep.subr.bf16.mxu0 %v382_v0 }
   0xe   :  { %363 = vmatprep.subr.bf16.mxu1 %v382_v0 }
  0x10   :  { %374 = vmatpush3.bf16.msra.mxu0 %v373_v26 }
  0x11   :  { %365 = vmatpush3.bf16.msra.mxu1 %v364_v17  ;;  %375 = vmatprep.subr.bf16.mxu0 %v382_v0 }
  0x14   :  { %377 = vmatpush3.bf16.msra.mxu0 %v376_v34 }
  0xda   :  { %v89_v28 = vpop.f32.mrb[0].mxu0 }
  0xdb   :  { %v90_v29 = vadd.f32 %v279_v27, %v89_v28  ;;  %v312_v30 = vpop.f32.mrb[1].mxu0 }
  0xdd   :  { %v93_v31 = vmax.f32 %v90_v29, 0.0 }
  0xdf   :  { %330 = vmatmul.mubr.msk.f32.vlgmr.msra.gmra.mrb[0].mxu1 %vm107_vm2, %v93_v31 }
 0x1b2   :  { %v177_v36 = vpop.f32.mrb[0].mxu1 }
 0x1b3   :  { %v178_v37 = vadd.f32 %v281_v35, %v177_v36  ;;  %v331_v38 = vpop.f32.mrb[1].mxu1 }
 0x1b5   :  { %v181_v39 = vmax.f32 %v178_v37, 0.0 }
 0x1b7   :  { %349 = vmatmul.mubr.msk.f32.vlgmr.msra.gmra.mrb[2].mxu0 %vm107_vm2, %v181_v39 }
 0x28a   :  { %v264_v41 = vpop.f32.mrb[2].mxu0 }
 0x28b   :  { %v265_v42 = vadd.f32 %v283_v40, %v264_v41  ;;  %v350_v43 = vpop.f32.mrb[3].mxu0 }
 0x28d   :  { %269 = vrot.lane.b32.xlu0 %v265_v42, %s385_s24 }
 0x2ff   :  { %v270_v44 = vpop.permute.xlu0 %269 }
 0x300   :  { %v272_v45 = vmin.f32 %v265_v42, %v270_v44 }
 0x302   :  { %274 = vst.msk [vmem:[%s475_s2] sm:$0xff] %vm273_vm3, %v272_v45 }

</bundles_post_ra>
